<compile_context>
chip_gen: v7x
topology: tpu7x:2x2x1
jax: 0.10.0
libtpu: 0.0.40
codegen_flags: <defaults>
</compile_context>

<pallas_src>
import math

import jax
import jax.numpy as jnp
from jax.experimental import pallas as pl
from jax.experimental.pallas import tpu as pltpu

INPUT_SIZE = 24
HIDDEN = 32
HEAD = 4
N_OUT = 2 * HEAD

X_MIN = jnp.array(
    [-3.1415927, -5.0, -5.0, -5.0, -3.1415927, -5.0, -3.1415927, -5.0, -0.0,
     -3.1415927, -5.0, -3.1415927, -5.0, -0.0, -1.0, -1.0, -1.0, -1.0, -1.0,
     -1.0, -1.0, -1.0, -1.0, -1.0], dtype=jnp.float32)
X_MAX = jnp.array(
    [3.1415927, 5.0, 5.0, 5.0, 3.1415927, 5.0, 3.1415927, 5.0, 5.0,
     3.1415927, 5.0, 3.1415927, 5.0, 5.0, 1.0, 1.0, 1.0, 1.0, 1.0,
     1.0, 1.0, 1.0, 1.0, 1.0], dtype=jnp.float32)
U_BOUND = 1.0
L_BOUND = -1.0


def _mhmlp_kernel(x_ref, w1_ref, b1_ref, wmu_ref, bmu_ref, wsg_ref, bsg_ref,
                  mu_ref, sig_ref):
    # Batch lives in the lane (last) dim -> loads, matmuls, transcendentals and
    # stores are all 128-lane dense.  The two heads are two tiny (4,32) matmuls
    # sharing h (MXU has huge slack), which lets each head write its own dense
    # (4, tile) output block with no sublane slicing / no discarded exp/tanh.
    x = x_ref[...]                                                # (24, T)
    h = jnp.tanh(
        jnp.dot(w1_ref[...], x, preferred_element_type=jnp.float32)
        + b1_ref[...])                                            # (32, T)
    mu_ref[...] = jnp.tanh(
        jnp.dot(wmu_ref[...], h, preferred_element_type=jnp.float32)
        + bmu_ref[...])                                           # (4, T)
    sig_ref[...] = jnp.exp(
        jnp.dot(wsg_ref[...], h, preferred_element_type=jnp.float32)
        + bsg_ref[...])                                           # (4, T)


def prepare_params(params):
    """One-time host-side transform:
      * fold min-max normalization into fc1:  W1' = a * W1, b1' = b1 + c @ W1
        with a = (u-l)/(x_max - x_min), c = l - a * x_min
      * transpose everything for the batch-in-lanes (feature-major) kernel.
    """
    w1, b1, w21, b21, w22, b22 = params
    a = (U_BOUND - L_BOUND) / (X_MAX - X_MIN)                     # (24,)
    c = L_BOUND - X_MIN * a                                       # (24,)
    w1f = w1 * a[:, None]                                         # (24, 32)
    b1f = b1 + c @ w1                                             # (32,)
    return (jnp.asarray(w1f.T, jnp.float32),                      # (32, 24)
            jnp.asarray(b1f, jnp.float32).reshape(HIDDEN, 1),     # (32, 1)
            jnp.asarray(w21.T, jnp.float32),                      # (4, 32)
            jnp.asarray(b21, jnp.float32).reshape(HEAD, 1),       # (4, 1)
            jnp.asarray(w22.T, jnp.float32),                      # (4, 32)
            jnp.asarray(b22, jnp.float32).reshape(HEAD, 1))       # (4, 1)


def _round_up(n, m):
    return (n + m - 1) // m * m


def _choose_tile(batch, tile_b):
    """Pick the batch (lane) tile.
      * big tiles amortize the ~0.35us per-step pipeline overhead,
      * keep >= 2 grid steps for large batches so v7x's two TensorCores both
        get work through the "parallel" axis,
      * keep masked-tail waste small (<~12.5%),
      * cap at 32768 so double-buffered blocks + h/z temporaries stay well
        inside v5e's 16 MiB default scoped VMEM / v7x's 64 MiB physical VMEM.
    """
    tile_b = max(128, (min(int(tile_b), 32768) // 128) * 128)
    if batch <= tile_b:
        if batch >= 1024:  # split into ~2 steps for megacore sharding
            return min(_round_up((batch + 1) // 2, 128), tile_b)
        return batch       # single block; width == full array dim (legal)
    t = tile_b
    while t > 1024 and (_round_up(batch, t) - batch) * 8 > batch:
        t //= 2            # shrink tile until ragged-tail waste is modest
    return t


def multi_head_mlp_forward_fm(x_fm, prepped, *, tile_b=16384):
    """Preferred (fast) entry point: feature-major end-to-end.

    x_fm: (24, B) float32.  Returns (mu_fm, sigma_fm), each (4, B) float32.
    No padding, no wrapper transposes, no output slicing.
    """
    w1t, b1t, wmut, bmut, wsgt, bsgt = prepped
    _, B = x_fm.shape
    tile = _choose_tile(B, tile_b)
    n_steps = pl.cdiv(B, tile)

    # VMEM estimate: double-buffered x blocks + double-buffered (sublane-padded)
    # mu/sigma blocks + h/z temporaries.  Never lower the limit below the
    # 32 MiB v6e/v7x default; cap under v7x's 64 MiB physical VMEM.
    vmem_est = (2 * INPUT_SIZE * tile * 4
                + 2 * 2 * 8 * tile * 4
                + (HIDDEN + N_OUT) * tile * 4)
    vmem_limit = int(min(max(32 << 20, 2 * vmem_est), 56 << 20))

    mu_fm, sig_fm = pl.pallas_call(
        _mhmlp_kernel,
        out_shape=(jax.ShapeDtypeStruct((HEAD, B), jnp.float32),
                   jax.ShapeDtypeStruct((HEAD, B), jnp.float32)),
        grid_spec=pltpu.PrefetchScalarGridSpec(
            num_scalar_prefetch=0,
            grid=(n_steps,),
            in_specs=[
                pl.BlockSpec((INPUT_SIZE, tile), lambda i: (0, i)),   # x tile
                pl.BlockSpec((HIDDEN, INPUT_SIZE), lambda i: (0, 0)),  # W1'^T
                pl.BlockSpec((HIDDEN, 1), lambda i: (0, 0)),           # b1'
                pl.BlockSpec((HEAD, HIDDEN), lambda i: (0, 0)),        # W_mu^T
                pl.BlockSpec((HEAD, 1), lambda i: (0, 0)),             # b_mu
                pl.BlockSpec((HEAD, HIDDEN), lambda i: (0, 0)),        # W_sg^T
                pl.BlockSpec((HEAD, 1), lambda i: (0, 0)),             # b_sg
            ],
            out_specs=[
                pl.BlockSpec((HEAD, tile), lambda i: (0, i)),          # mu
                pl.BlockSpec((HEAD, tile), lambda i: (0, i)),          # sigma
            ],
        ),
        compiler_params=pltpu.CompilerParams(
            dimension_semantics=("parallel",),
            vmem_limit_bytes=vmem_limit),
        cost_estimate=pl.CostEstimate(
            flops=2 * B * (INPUT_SIZE * HIDDEN + HIDDEN * N_OUT),
            transcendentals=(HIDDEN + N_OUT) * B,
            bytes_accessed=B * (INPUT_SIZE + N_OUT) * 4),
    )(x_fm, w1t, b1t, wmut, bmut, wsgt, bsgt)
    return mu_fm, sig_fm


def multi_head_mlp_forward(x, prepped, *, tile_b=16384):
    """Module-compatible wrapper: x (B, 24) -> (mu (B,4), sigma (B,4)).

    Only does the unavoidable boundary transposes (adds ~1.5x HBM traffic over
    the kernel minimum).  Callers that can keep activations feature-major
    should use `multi_head_mlp_forward_fm` directly (zero wrapper traffic).
    """
    mu_fm, sig_fm = multi_head_mlp_forward_fm(x.T, prepped, tile_b=tile_b)
    return mu_fm.T, sig_fm.T


def _xavier_uniform(key, fan_in, fan_out):
    bound = math.sqrt(6.0 / (fan_in + fan_out))
    return jax.random.uniform(key, (fan_in, fan_out), jnp.float32,
                              minval=-bound, maxval=bound)


def init_params(key):
    k1, k2, k3 = jax.random.split(key, 3)
    w1 = _xavier_uniform(k1, INPUT_SIZE, HIDDEN)
    b1 = jnp.full((HIDDEN,), 0.01, jnp.float32)
    w21 = _xavier_uniform(k2, HIDDEN, HEAD)
    b21 = jnp.full((HEAD,), 0.01, jnp.float32)
    w22 = _xavier_uniform(k3, HIDDEN, HEAD)
    b22 = jnp.full((HEAD,), 0.01, jnp.float32)
    return (w1, b1, w21, b21, w22, b22)


def _reference_forward(x, params):
    """Pure-JAX reference (original un-folded math) for correctness check."""
    w1, b1, w21, b21, w22, b22 = params
    xn = (x - X_MIN) / (X_MAX - X_MIN) * (U_BOUND - L_BOUND) + L_BOUND
    h = jnp.tanh(xn @ w1 + b1)
    return jnp.tanh(h @ w21 + b21), jnp.exp(h @ w22 + b22)


if __name__ == "__main__":
    key = jax.random.PRNGKey(0)
    pkey, k1, k2, k3 = jax.random.split(key, 4)
    params = init_params(pkey)
    prepped = prepare_params(params)

    # 1) Small module-shaped batch (B, 24) -> ((B,4),(B,4)); single-block path.
    B = 8
    x = jax.random.uniform(k1, (B, INPUT_SIZE), jnp.float32,
                           minval=-1.0, maxval=1.0) * (X_MAX * 0.5)
    mu, sig = multi_head_mlp_forward(x, prepped)
    jax.block_until_ready((mu, sig))
    mu_r, sig_r = _reference_forward(x, params)
    assert mu.shape == (B, HEAD) and sig.shape == (B, HEAD)
    assert jnp.allclose(mu, mu_r, atol=1e-5, rtol=1e-4)
    assert jnp.allclose(sig, sig_r, atol=1e-4, rtol=1e-4)

    # 2) Multi-step grid with a masked ragged tail (no whole-batch padding).
    B2 = 300
    x2 = jax.random.uniform(k2, (B2, INPUT_SIZE), jnp.float32,
                            minval=-1.0, maxval=1.0) * (X_MAX * 0.5)
    mu2, sig2 = multi_head_mlp_forward(x2, prepped, tile_b=128)
    jax.block_until_ready((mu2, sig2))
    mu2_r, sig2_r = _reference_forward(x2, params)
    assert mu2.shape == (B2, HEAD) and sig2.shape == (B2, HEAD)
    assert jnp.allclose(mu2, mu2_r, atol=1e-5, rtol=1e-4)
    assert jnp.allclose(sig2, sig2_r, atol=1e-4, rtol=1e-4)

    # 3) Feature-major fast path (preferred calling convention), >=2 grid steps.
    B3 = 2048
    x3 = jax.random.uniform(k3, (B3, INPUT_SIZE), jnp.float32,
                            minval=-1.0, maxval=1.0) * (X_MAX * 0.5)
    mu3_fm, sig3_fm = multi_head_mlp_forward_fm(x3.T, prepped)
    jax.block_until_ready((mu3_fm, sig3_fm))
    mu3_r, sig3_r = _reference_forward(x3, params)
    assert mu3_fm.shape == (HEAD, B3) and sig3_fm.shape == (HEAD, B3)
    assert jnp.allclose(mu3_fm.T, mu3_r, atol=1e-5, rtol=1e-4)
    assert jnp.allclose(sig3_fm.T, sig3_r, atol=1e-4, rtol=1e-4)

    print("KERNEL_OK")
</pallas_src>

<mosaic_0001>
module attributes {stable_mosaic.version = 11 : i64} {
  func.func @_mhmlp_kernel(%arg0: i32, %arg1: memref<24x8xf32, #tpu.memory_space<vmem>>, %arg2: memref<32x24xf32, #tpu.memory_space<vmem>>, %arg3: memref<32x1xf32, #tpu.memory_space<vmem>>, %arg4: memref<4x32xf32, #tpu.memory_space<vmem>>, %arg5: memref<4x1xf32, #tpu.memory_space<vmem>>, %arg6: memref<4x32xf32, #tpu.memory_space<vmem>>, %arg7: memref<4x1xf32, #tpu.memory_space<vmem>>, %arg8: memref<4x8xf32, #tpu.memory_space<vmem>>, %arg9: memref<4x8xf32, #tpu.memory_space<vmem>>) attributes {dimension_semantics = [#tpu.dimension_semantics<parallel>], iteration_bounds = array<i64: 1>, scalar_prefetch = 0 : i64, scratch_operands = 0 : i64, tpu.core_type = #tpu.core_type<tc>, window_params = [{transform_indices = @transform_0, window_bounds = array<i64: 24, 8>}, {pipeline_mode = #tpu.pipeline_mode<synchronous>, transform_indices = @transform_1, window_bounds = array<i64: 32, 24>}, {pipeline_mode = #tpu.pipeline_mode<synchronous>, transform_indices = @transform_2, window_bounds = array<i64: 32, 1>}, {pipeline_mode = #tpu.pipeline_mode<synchronous>, transform_indices = @transform_3, window_bounds = array<i64: 4, 32>}, {pipeline_mode = #tpu.pipeline_mode<synchronous>, transform_indices = @transform_4, window_bounds = array<i64: 4, 1>}, {pipeline_mode = #tpu.pipeline_mode<synchronous>, transform_indices = @transform_5, window_bounds = array<i64: 4, 32>}, {pipeline_mode = #tpu.pipeline_mode<synchronous>, transform_indices = @transform_6, window_bounds = array<i64: 4, 1>}, {transform_indices = @transform_7, window_bounds = array<i64: 4, 8>}, {transform_indices = @transform_8, window_bounds = array<i64: 4, 8>}]} {
    %c0 = arith.constant 0 : index
    %c0_0 = arith.constant 0 : index
    %0 = vector.load %arg1[%c0, %c0_0] : memref<24x8xf32, #tpu.memory_space<vmem>>, vector<24x8xf32>
    %c0_1 = arith.constant 0 : index
    %c0_2 = arith.constant 0 : index
    %1 = vector.load %arg2[%c0_1, %c0_2] : memref<32x24xf32, #tpu.memory_space<vmem>>, vector<32x24xf32>
    %cst = arith.constant dense<0.000000e+00> : vector<32x8xf32>
    %2 = tpu.matmul %1, %0, %cst {dimension_numbers = #tpu.dot_dimension_numbers<[1], [0], [0], [1], [0, 0, 1, 1], [], []>} : vector<32x24xf32>, vector<24x8xf32>, vector<32x8xf32> -> vector<32x8xf32>
    %c0_3 = arith.constant 0 : index
    %c0_4 = arith.constant 0 : index
    %3 = vector.load %arg3[%c0_3, %c0_4] : memref<32x1xf32, #tpu.memory_space<vmem>>, vector<32x1xf32>
    %4 = vector.broadcast %3 : vector<32x1xf32> to vector<32x8xf32>
    %5 = arith.addf %2, %4 : vector<32x8xf32>
    %6 = math.tanh %5 : vector<32x8xf32>
    %c0_5 = arith.constant 0 : index
    %c0_6 = arith.constant 0 : index
    %7 = vector.load %arg4[%c0_5, %c0_6] : memref<4x32xf32, #tpu.memory_space<vmem>>, vector<4x32xf32>
    %cst_7 = arith.constant dense<0.000000e+00> : vector<4x8xf32>
    %8 = tpu.matmul %7, %6, %cst_7 {dimension_numbers = #tpu.dot_dimension_numbers<[1], [0], [0], [1], [0, 0, 1, 1], [], []>} : vector<4x32xf32>, vector<32x8xf32>, vector<4x8xf32> -> vector<4x8xf32>
    %c0_8 = arith.constant 0 : index
    %c0_9 = arith.constant 0 : index
    %9 = vector.load %arg5[%c0_8, %c0_9] : memref<4x1xf32, #tpu.memory_space<vmem>>, vector<4x1xf32>
    %10 = vector.broadcast %9 : vector<4x1xf32> to vector<4x8xf32>
    %11 = arith.addf %8, %10 : vector<4x8xf32>
    %12 = math.tanh %11 : vector<4x8xf32>
    %c0_10 = arith.constant 0 : index
    %c0_11 = arith.constant 0 : index
    %13 = vector.load %arg8[%c0_10, %c0_11] : memref<4x8xf32, #tpu.memory_space<vmem>>, vector<4x8xf32>
    tpu.vector_store %arg8[%c0_10, %c0_11], %12 {strides = array<i32>} : memref<4x8xf32, #tpu.memory_space<vmem>>, vector<4x8xf32>,
    %c0_12 = arith.constant 0 : index
    %c0_13 = arith.constant 0 : index
    %14 = vector.load %arg6[%c0_12, %c0_13] : memref<4x32xf32, #tpu.memory_space<vmem>>, vector<4x32xf32>
    %cst_14 = arith.constant dense<0.000000e+00> : vector<4x8xf32>
    %15 = tpu.matmul %14, %6, %cst_14 {dimension_numbers = #tpu.dot_dimension_numbers<[1], [0], [0], [1], [0, 0, 1, 1], [], []>} : vector<4x32xf32>, vector<32x8xf32>, vector<4x8xf32> -> vector<4x8xf32>
    %c0_15 = arith.constant 0 : index
    %c0_16 = arith.constant 0 : index
    %16 = vector.load %arg7[%c0_15, %c0_16] : memref<4x1xf32, #tpu.memory_space<vmem>>, vector<4x1xf32>
    %17 = vector.broadcast %16 : vector<4x1xf32> to vector<4x8xf32>
    %18 = arith.addf %15, %17 : vector<4x8xf32>
    %19 = math.exp %18 : vector<4x8xf32>
    %c0_17 = arith.constant 0 : index
    %c0_18 = arith.constant 0 : index
    %20 = vector.load %arg9[%c0_17, %c0_18] : memref<4x8xf32, #tpu.memory_space<vmem>>, vector<4x8xf32>
    tpu.vector_store %arg9[%c0_17, %c0_18], %19 {strides = array<i32>} : memref<4x8xf32, #tpu.memory_space<vmem>>, vector<4x8xf32>,
    return
  }
  func.func @transform_0(%arg0: i32) -> (i32, i32) {
    %c0_i32 = arith.constant 0 : i32
    %c0_i32_0 = arith.constant 0 : i32
    return %c0_i32, %arg0 : i32, i32
  }
  func.func @transform_1(%arg0: i32) -> (i32, i32) {
    %c0_i32 = arith.constant 0 : i32
    %c0_i32_0 = arith.constant 0 : i32
    %c0_i32_1 = arith.constant 0 : i32
    return %c0_i32, %c0_i32_0 : i32, i32
  }
  func.func @transform_2(%arg0: i32) -> (i32, i32) {
    %c0_i32 = arith.constant 0 : i32
    %c0_i32_0 = arith.constant 0 : i32
    %c0_i32_1 = arith.constant 0 : i32
    return %c0_i32, %c0_i32_0 : i32, i32
  }
  func.func @transform_3(%arg0: i32) -> (i32, i32) {
    %c0_i32 = arith.constant 0 : i32
    %c0_i32_0 = arith.constant 0 : i32
    %c0_i32_1 = arith.constant 0 : i32
    return %c0_i32, %c0_i32_0 : i32, i32
  }
  func.func @transform_4(%arg0: i32) -> (i32, i32) {
    %c0_i32 = arith.constant 0 : i32
    %c0_i32_0 = arith.constant 0 : i32
    %c0_i32_1 = arith.constant 0 : i32
    return %c0_i32, %c0_i32_0 : i32, i32
  }
  func.func @transform_5(%arg0: i32) -> (i32, i32) {
    %c0_i32 = arith.constant 0 : i32
    %c0_i32_0 = arith.constant 0 : i32
    %c0_i32_1 = arith.constant 0 : i32
    return %c0_i32, %c0_i32_0 : i32, i32
  }
  func.func @transform_6(%arg0: i32) -> (i32, i32) {
    %c0_i32 = arith.constant 0 : i32
    %c0_i32_0 = arith.constant 0 : i32
    %c0_i32_1 = arith.constant 0 : i32
    return %c0_i32, %c0_i32_0 : i32, i32
  }
  func.func @transform_7(%arg0: i32) -> (i32, i32) {
    %c0_i32 = arith.constant 0 : i32
    %c0_i32_0 = arith.constant 0 : i32
    return %c0_i32, %arg0 : i32, i32
  }
  func.func @transform_8(%arg0: i32) -> (i32, i32) {
    %c0_i32 = arith.constant 0 : i32
    %c0_i32_0 = arith.constant 0 : i32
    return %c0_i32, %arg0 : i32, i32
  }
}

</mosaic_0001>

<bundles_post_ra>
// kernel: tpu_custom_call.1
= control target key start
LH: loop header
LB: loop body
LE: loop exit
PB: predicated region body
PF: predicated region fallthrough
CT: control target
= control target key end

     0   :  { %14 = vsyncpa [#allocation3], 0  ;;  %vm61_vm0 = vcmask 195584   ;;  %v499_v4 = vmov 0   ;;  %s625_s0 = inlined_call_operand.vmem [shape: f32[24,8], index: 0, kind: input, shape index: {}]   ;;  %s626_s1 = inlined_call_operand.vmem [shape: f32[32,24], index: 1, kind: input, shape index: {}]   ;;  %s627_s2 = inlined_call_operand.vmem [shape: f32[32,1], index: 2, kind: input, shape index: {}]   ;;  %s628_s3 = inlined_call_operand.vmem [shape: f32[4,32], index: 3, kind: input, shape index: {}]   ;;  %s629_s4 = inlined_call_operand.vmem [shape: f32[4,1], index: 4, kind: input, shape index: {}]   ;;  %s630_s5 = inlined_call_operand.vmem [shape: f32[4,32], index: 5, kind: input, shape index: {}]   ;;  %s631_s6 = inlined_call_operand.vmem [shape: f32[4,1], index: 6, kind: input, shape index: {}]   ;;  %s632_s7 = inlined_call_operand.hbm [shape: f32[4,8], index: 7, kind: output, shape index: {0}]   ;;  %s633_s8 = inlined_call_operand.hbm [shape: f32[4,8], index: 8, kind: output, shape index: {1}]  }
   0x1   :  { %v30_v0 = vld [vmem:[%s625_s0] sm:$0xff]  ;;  %v31_v1 = vld [vmem:[%s625_s0 + $0x8] sm:$0xff]  ;;  %437 = vset.pattern.permute.xlu0 %v499_v4  ;;  %438 = vset.pattern.permute.xlu1 %v499_v4  ;;  %v32_v5 = vld [vmem:[%s625_s0 + $0x10] sm:$0xff] }
   0x2   :  { %v415_v2 = vpack.c.bf16 %v31_v1, %v30_v0  ;;  %v33_v3 = vld [vmem:[%s626_s1] sm:$0xff]  ;;  %v39_v7 = vld [vmem:[%s627_s2 + $0x10] sm:$0xff]  ;;  %v38_v8 = vld [vmem:[%s627_s2 + $0x8] sm:$0xff] }
   0x3   :  { %387 = vmatprep.mubr.msk.f32.mxu0 %vm61_vm0, %v33_v3  ;;  %v37_v6 = vld [vmem:[%s627_s2] sm:$0xff]  ;;  %53 = vperm.xlu1 %438, %v39_v7  }
   0x4   :  { %416 = vmatprep.subr.bf16.mxu0 %v415_v2  ;;  %43 = vperm.xlu0 %437, %v37_v6  }
   0x5   :  { %418 = vmatpush3.bf16.msra.mxu0 %v415_v2 }
   0x6   :  { %15 = vsyncpa [#allocation5], 0  ;;  %385 = vmatprep.subr.mxu0 %v32_v5  ;;  %v40_v9 = vld [vmem:[%s627_s2 + $0x18] sm:$0xff]  ;;  %v34_v10 = vld [vmem:[%s626_s1 + $0x8] sm:$0xff]  ;;  %v500_v15 = vmov 0.0|0.0   ;;  %vm501_vm1 = vmmov 0  }
   0x7   :  { %v35_v11 = vld [vmem:[%s626_s1 + $0x10] sm:$0xff]  ;;  %58 = vperm.xlu1 %438, %v40_v9   ;;  %v248_v12 = vld [vmem:[%s631_s6] sm:$0xf]  ;;  %v36_v14 = vld [vmem:[%s626_s1 + $0x18] sm:$0xff]  ;;  %419 = vmatprep.subr.bf16.mxu1 %v500_v15  ;;  %v502_v16 = vmov 0.0   ;;  %vm170_vm2 = vcmask 261120  }
   0x8   :  { %48 = vperm.xlu0 %437, %v38_v8   ;;  %v164_v13 = vld [vmem:[%s629_s4] sm:$0xf]  ;;  %401 = vmatprep.mubr.msk.f32.mxu1 %vm501_vm1, %v502_v16  ;;  %s503_s30 = smov [#allocation2]   ;;  %vm245_vm3 = vcmask 60416   ;;  %s504_s9 = smov [#allocation4]  }
   0x9   :  { %386 = vmatpush3.msra.mxu0 %v32_v5  ;;  %v163_v35 = vld [vmem:[%s628_s3] sm:$0xf]  ;;  %s336_s3 = sshll.u32 %s503_s30, 4  ;;  %s346_s10 = sshll.u32 %s504_s9, 4  ;;  %s337_s3 = int_to_ptr.vmem [resolvable:$true] %s336_s3  ;;  %s347_s10 = int_to_ptr.vmem [resolvable:$true] %s346_s10 }
   0xa   :  { %388 = vmatmul.mubr.msk.f32.vlgmr.msra.gmra.mrb[0].mxu0 %vm61_vm0, %v34_v10  ;;  %425 = vmatprep.subr.bf16.mxu0 %v500_v15  ;;  %v247_v36 = vld [vmem:[%s630_s5] sm:$0xf]  ;;  %s451_s5 = scalar_lea.vmem %s337_s3, 64  ;;  %p456_p1 = scmp.lt.s32.totalorder %s337_s3, %s337_s3 }
   0xb   :  { %390 = vmatprep.mubr.msk.f32.mxu0 %vm61_vm0, %v35_v11  ;;  %167 = vperm.xlu1 %438, %v164_v13   ;;  %p452_p0 = scmp.ne.s32.totalorder %s337_s3, %s451_s5  ;;  %p457_p2 = scmp.lt.s32.totalorder %s451_s5, %s451_s5 }
   0xc   :  { %251 = vperm.xlu0 %437, %v248_v12  }
   0xd   :  { %p458_p3 = por %p457_p2, %p456_p1 }
   0xe   :  { %391 = vmatmul.mubr.msk.f32.gmra.mrb[2].mxu0 %vm61_vm0, %v36_v14 }
   0xf   :  { %412 = vmatprep.mubr.msk.f32.mxu0 %vm501_vm1, %v502_v16  ;;  %p459_p4 = pnand %p458_p3, %p452_p0 }
  0x82   :  { %v54_v18 = vpop.permute.xlu1 %53 }
  0x83   :  { %v44_v17 = vpop.permute.xlu0 %43 }
  0x86   :  { %v59_v24 = vpop.permute.xlu1 %58 }
  0x87   :  { %v49_v19 = vpop.permute.xlu0 %48 }
  0x8a   :  { %v168_v38 = vpop.permute.xlu1 %167 }
  0x8b   :  { %v252_v37 = vpop.permute.xlu0 %251 }
  0xdd   :  { %v389_v20 = vpop.f32.mrb[0].mxu0 }
  0xde   :  { %v146_v21 = vadd.f32 %v389_v20, %v49_v19  ;;  %v140_v22 = vpop.f32.mrb[1].mxu0 }
  0xdf   :  { %v141_v23 = vadd.f32 %v140_v22, %v44_v17 }
  0xe0   :  { %439 = vtanh.f32 %v146_v21 }
  0xe1   :  { %441 = vtanh.f32 %v141_v23  ;;  %v392_v25 = vpop.f32.mrb[2].mxu0 }
  0xe2   :  { %v156_v26 = vadd.f32 %v392_v25, %v59_v24  ;;  %v150_v27 = vpop.f32.mrb[3].mxu0 }
  0xe3   :  { %v151_v28 = vadd.f32 %v150_v27, %v54_v18 }
  0xe4   :  { %443 = vtanh.f32 %v156_v26 }
  0xe5   :  { %445 = vtanh.f32 %v151_v28 }
  0xea   :  { %v440_v29 = vpop.eup %439 }
  0xeb   :  { %v442_v30 = vpop.eup %441 }
  0xec   :  { %v420_v31 = vpack.c.bf16 %v440_v29, %v442_v30 }
  0xee   :  { %v444_v32 = vpop.eup %443  ;;  %421 = vmatpush3.bf16.msra.mxu1 %v420_v31  ;;  %427 = vmatpush3.bf16.msra.mxu0 %v420_v31 }
  0xef   :  { %v446_v33 = vpop.eup %445  ;;  %422 = vmatprep.subr.bf16.mxu1 %v500_v15  ;;  %428 = vmatprep.subr.bf16.mxu0 %v500_v15 }
  0xf0   :  { %v423_v34 = vpack.c.bf16 %v444_v32, %v446_v33 }
  0xf2   :  { %424 = vmatpush3.bf16.msra.mxu1 %v423_v34  ;;  %430 = vmatpush3.bf16.msra.mxu0 %v423_v34 }
  0xf5   :  { %402 = vmatmul.mubr.msk.f32.vlgmr.msra.gmra.mrb[0].mxu1 %vm170_vm2, %v163_v35  ;;  %413 = vmatmul.mubr.msk.f32.vlgmr.msra.gmra.mrb[4].mxu0 %vm170_vm2, %v247_v36 }
 0x1c8   :  { %v240_v39 = vpop.f32.mrb[0].mxu1  ;;  %v323_v40 = vpop.f32.mrb[4].mxu0 }
 0x1c9   :  { %v241_v41 = vadd.f32 %v240_v39, %v168_v38  ;;  %v324_v42 = vadd.f32 %v323_v40, %v252_v37  ;;  %v414_v43 = vpop.f32.mrb[5].mxu0  ;;  %v403_v44 = vpop.f32.mrb[1].mxu1 }
 0x1cb   :  { %447 = vtanh.f32 %v241_v41  ;;  %v327_v45 = vmul.f32 1.442695, %v324_v42 }
 0x1cd   :  { %449 = vpow2.f32 %v327_v45 }
 0x1d5   :  { %v448_v46 = vpop.eup %447 }
 0x1d6   :  { %246 = vst.msk [vmem:[#allocation2] sm:$0xf] %vm245_vm3, %v448_v46 }
 0x1d7   :  { %v450_v47 = vpop.eup %449 }
 0x1d8   :  { %462 = shalt.err (!%p459_p4)
}
 0x1d9   :  { %s463_s13 = scalar_lea.hbm %s632_s7, 64 }
 0x1da   :  { %p464_p5 = scmp.ne.s32.totalorder %s632_s7, %s463_s13  ;;  %p467_p6 = scmp.lt.u32.totalorder %s463_s13, %s632_s7 }
 0x1dc   :  { %p469_p7 = pnand %p467_p6, %p464_p5 }
 0x1de   :  { %472 = shalt.err (!%p469_p7)
}
 0x1df   :  { %339 = dma.vmem_to_hbm [thread:$0]  %s337_s3, 64, %s632_s7, [#allocation3]   ;;  %329 = vst.msk [vmem:[#allocation4] sm:$0xf] %vm245_vm3, %v450_v47 }
 0x1e0   :  { %s473_s19 = scalar_lea.vmem %s347_s10, 64  ;;  %p478_p9 = scmp.lt.s32.totalorder %s347_s10, %s347_s10 }
 0x1e1   :  { %p474_p8 = scmp.ne.s32.totalorder %s347_s10, %s473_s19  ;;  %p479_p10 = scmp.lt.s32.totalorder %s473_s19, %s473_s19 }
 0x1e3   :  { %p480_p11 = por %p479_p10, %p478_p9 }
 0x1e5   :  { %p481_p12 = pnand %p480_p11, %p474_p8 }
 0x1e7   :  { %484 = shalt.err (!%p481_p12)
}
 0x1e8   :  { %s485_s22 = scalar_lea.hbm %s633_s8, 64 }
 0x1e9   :  { %p486_p13 = scmp.ne.s32.totalorder %s633_s8, %s485_s22  ;;  %p489_p0 = scmp.lt.u32.totalorder %s485_s22, %s633_s8 }
 0x1eb   :  { %p491_p1 = pnand %p489_p0, %p486_p13 }
 0x1ed   :  { %494 = shalt.err (!%p491_p1)
}
 0x1ee   :  { %349 = dma.vmem_to_hbm [thread:$0]  %s347_s10, 64, %s633_s8, [#allocation5]  }
 0x1ef   :  { %495 = dma.done.wait [#allocation3], 64  }
 0x1f0   :  { %496 = vsyncadd [#allocation3], 4294967232 }
 0x1f1   :  { %497 = dma.done.wait [#allocation5], 64  }
 0x1f2   :  { %498 = vsyncadd [#allocation5], 4294967232 }
 0x1f3   :  { %356 = vsyncpa [#allocation3], 1 }
 0x1f4   :  { %357 = vsyncpa [#allocation5], 1 }

</bundles_post_ra>
